<compile_context>
chip_gen: v6e
topology: v6e:2x2x1
jax: 0.10.0
libtpu: 0.0.40
codegen_flags: <defaults>
</compile_context>

<pallas_src>
import math

import jax
import jax.numpy as jnp
from jax.experimental import pallas as pl
from jax.experimental.pallas import tpu as pltpu

_TWO_PI = 2.0 * math.pi
_TB_MIN = 512                         # rows: keeps per-step overhead amortized
_TB_MAX = 2048                        # rows: cap
_VMEM_TILE_BUDGET = 8 * 1024 * 1024   # bytes: double-buffered out tile + temps


def _cdiv(a, b):
    return -(-a // b)


def _round_up(v, m):
    return _cdiv(v, m) * m


def _gfp_kernel(x_ref, w_ref, out_ref):
    # x_ref: (TB, 1) f32, w_ref: (1, Hp) f32, out_ref: (TB, 2*Hp) — all VMEM.
    half = w_ref.shape[1]
    # Same rounding order as the reference: (x * W) * 2pi.  The extra VPU
    # multiply is fully hidden under the EUP sin/cos + HBM writeback.
    proj = (x_ref[...] * w_ref[...]) * _TWO_PI
    # half is a multiple of 128 (wrapper guarantees it) -> both halves are
    # unmasked, lane-aligned vst stores.
    out_ref[:, :half] = jnp.sin(proj).astype(out_ref.dtype)
    out_ref[:, half:] = jnp.cos(proj).astype(out_ref.dtype)


def _pick_batch_tile(B, Hp, out_itemsize, row_align):
    # Per-row VMEM bytes: double-buffered output tile + f32 proj/sin/cos temps.
    per_row = 2 * (2 * Hp) * out_itemsize + 3 * Hp * 4
    tb = _VMEM_TILE_BUDGET // per_row
    tb = max(_TB_MIN, min(_TB_MAX, tb))
    # v7x: ensure >= 2 batch tiles on mid/large batches so the second
    # TensorCore isn't idle under dimension_semantics=("parallel",).
    if B >= 1024:
        tb = min(tb, _round_up(_cdiv(B, 2), row_align))
    # Equalize tiles so padded-row writeback (Bp - B) stays small for ragged B.
    n_tiles = max(1, _cdiv(B, tb))
    tb = _round_up(_cdiv(B, n_tiles), row_align)
    tb = max(row_align, min(tb, _round_up(B, row_align)))
    return tb


def gaussian_fourier_projection(x, W, *, out_dtype=jnp.float32, force_pallas=False):
    """x: (B,) float, W: (H,) float -> (B, 2*H) `out_dtype`.

    Matches torch.cat([sin(x[:,None]*W*2pi), cos(x[:,None]*W*2pi)], -1).
    """
    B = x.shape[0]
    H = W.shape[0]

    # Tiny-problem fast path: launch overhead dominates for small diffusion
    # time-step batches; let XLA fuse the sin/cos into the consumer instead.
    if not force_pallas and B * 2 * H < (1 << 16):
        proj = (x.astype(jnp.float32)[:, None] * W.astype(jnp.float32)[None, :]) * _TWO_PI
        return jnp.concatenate([jnp.sin(proj), jnp.cos(proj)], axis=-1).astype(out_dtype)

    out_itemsize = jnp.dtype(out_dtype).itemsize
    row_align = 16 if out_itemsize < 4 else 8   # bf16 output needs (16,128) tiles

    # Lane-align the half width so the sin/cos split lands on a 128 boundary.
    Hp = _round_up(H, 128)
    tb = _pick_batch_tile(B, Hp, out_itemsize, row_align)
    Bp = _round_up(B, tb)
    grid = (Bp // tb,)

    x2 = x.reshape(B, 1).astype(jnp.float32)
    if Bp != B:
        x2 = jnp.pad(x2, ((0, Bp - B), (0, 0)))
    w2 = W.reshape(1, H).astype(jnp.float32)
    if Hp != H:
        w2 = jnp.pad(w2, ((0, 0), (0, Hp - H)))

    # VMEM footprint: double-buffered out + x tiles, resident W, f32 temps.
    footprint = (2 * tb * 2 * Hp * out_itemsize   # output, double-buffered
                 + 2 * tb * 4                     # x tiles, double-buffered
                 + 2 * Hp * 4                     # W row
                 + 3 * tb * Hp * 4)               # proj / sin / cos temps
    vmem_limit = int(min(48 * 1024 * 1024,
                         max(16 * 1024 * 1024, footprint * 3 // 2)))

    cost = pl.CostEstimate(
        flops=2 * Bp * Hp,
        transcendentals=2 * Bp * Hp,
        bytes_accessed=Bp * 4 + Hp * 4 + Bp * 2 * Hp * out_itemsize,
    )

    out_full = pl.pallas_call(
        _gfp_kernel,
        out_shape=jax.ShapeDtypeStruct((Bp, 2 * Hp), out_dtype),
        grid_spec=pltpu.PrefetchScalarGridSpec(
            num_scalar_prefetch=0,
            grid=grid,
            in_specs=[
                pl.BlockSpec((tb, 1), lambda i: (i, 0)),   # x tile per step
                pl.BlockSpec((1, Hp), lambda i: (0, 0)),   # W resident
            ],
            out_specs=pl.BlockSpec((tb, 2 * Hp), lambda i: (i, 0)),
        ),
        compiler_params=pltpu.CompilerParams(
            dimension_semantics=("parallel",),  # v7x: shard batch tiles over 2 TCs
            vmem_limit_bytes=vmem_limit,
        ),
        cost_estimate=cost,
    )(x2, w2)

    if Hp == H:
        return out_full if Bp == B else out_full[:B]
    # TODO(synk): for H % 128 != 0 this concatenate is an extra full-output HBM
    # pass; consumers that accept the padded sin|cos layout should read
    # out_full directly instead.
    return jnp.concatenate([out_full[:B, :H], out_full[:B, Hp:Hp + H]], axis=-1)


if __name__ == "__main__":
    embed_dim = 256          # -> H = 128 (lane-aligned half)
    scale = 30.0
    batch = 8

    key = jax.random.PRNGKey(0)
    k_w, k_x = jax.random.split(key)

    # Deterministic frozen parameter (same shape/scale as the torch module).
    W = jax.random.normal(k_w, (embed_dim // 2,), dtype=jnp.float32) * scale
    # Example "time step" inputs.
    x = jax.random.uniform(k_x, (batch,), dtype=jnp.float32)

    out = gaussian_fourier_projection(x, W, force_pallas=True)
    out = jax.block_until_ready(out)

    # Reference check in plain JAX (same math/order as the torch forward).
    proj_ref = x[:, None] * W[None, :] * 2.0 * math.pi
    ref = jnp.concatenate([jnp.sin(proj_ref), jnp.cos(proj_ref)], axis=-1)

    assert out.shape == (batch, embed_dim), out.shape
    # |x_proj| reaches ~2*pi*scale*|W_max| (~5e2); f32 sin/cos range reduction
    # limits achievable agreement to roughly |arg| * eps_f32 (~3e-5), so use a
    # 5e-4 absolute tolerance on the bounded [-1, 1] outputs.
    err = float(jnp.max(jnp.abs(out - ref)))
    assert err < 5e-4, f"max abs err {err}"
    print("KERNEL_OK")
</pallas_src>

<mosaic_0001>
module attributes {stable_mosaic.version = 11 : i64} {
  func.func @_gfp_kernel(%arg0: i32, %arg1: memref<8x1xf32, #tpu.memory_space<vmem>>, %arg2: memref<1x128xf32, #tpu.memory_space<vmem>>, %arg3: memref<8x256xf32, #tpu.memory_space<vmem>>) attributes {dimension_semantics = [#tpu.dimension_semantics<parallel>], iteration_bounds = array<i64: 1>, scalar_prefetch = 0 : i64, scratch_operands = 0 : i64, tpu.core_type = #tpu.core_type<tc>, window_params = [{transform_indices = @transform_0, window_bounds = array<i64: 8, 1>}, {pipeline_mode = #tpu.pipeline_mode<synchronous>, transform_indices = @transform_1, window_bounds = array<i64: 1, 128>}, {transform_indices = @transform_2, window_bounds = array<i64: 8, 256>}]} {
    %c0 = arith.constant 0 : index
    %c0_0 = arith.constant 0 : index
    %0 = vector.load %arg1[%c0, %c0_0] : memref<8x1xf32, #tpu.memory_space<vmem>>, vector<8x1xf32>
    %c0_1 = arith.constant 0 : index
    %c0_2 = arith.constant 0 : index
    %1 = vector.load %arg2[%c0_1, %c0_2] : memref<1x128xf32, #tpu.memory_space<vmem>>, vector<1x128xf32>
    %2 = vector.broadcast %0 : vector<8x1xf32> to vector<8x128xf32>
    %3 = vector.broadcast %1 : vector<1x128xf32> to vector<8x128xf32>
    %4 = arith.mulf %2, %3 : vector<8x128xf32>
    %cst = arith.constant 6.28318548 : f32
    %5 = vector.broadcast %cst : f32 to vector<8x128xf32>
    %6 = arith.mulf %4, %5 : vector<8x128xf32>
    %7 = math.sin %6 : vector<8x128xf32>
    %c0_3 = arith.constant 0 : index
    %c0_4 = arith.constant 0 : index
    %8 = vector.load %arg3[%c0_3, %c0_4] : memref<8x256xf32, #tpu.memory_space<vmem>>, vector<8x128xf32>
    tpu.vector_store %arg3[%c0_3, %c0_4], %7 {strides = array<i32>} : memref<8x256xf32, #tpu.memory_space<vmem>>, vector<8x128xf32>,
    %9 = math.cos %6 : vector<8x128xf32>
    %c0_5 = arith.constant 0 : index
    %c128 = arith.constant 128 : index
    %10 = vector.load %arg3[%c0_5, %c128] : memref<8x256xf32, #tpu.memory_space<vmem>>, vector<8x128xf32>
    tpu.vector_store %arg3[%c0_5, %c128], %9 {strides = array<i32>} : memref<8x256xf32, #tpu.memory_space<vmem>>, vector<8x128xf32>,
    return
  }
  func.func @transform_0(%arg0: i32) -> (i32, i32) {
    %c0_i32 = arith.constant 0 : i32
    %c0_i32_0 = arith.constant 0 : i32
    return %arg0, %c0_i32 : i32, i32
  }
  func.func @transform_1(%arg0: i32) -> (i32, i32) {
    %c0_i32 = arith.constant 0 : i32
    %c0_i32_0 = arith.constant 0 : i32
    %c0_i32_1 = arith.constant 0 : i32
    return %c0_i32, %c0_i32_0 : i32, i32
  }
  func.func @transform_2(%arg0: i32) -> (i32, i32) {
    %c0_i32 = arith.constant 0 : i32
    %c0_i32_0 = arith.constant 0 : i32
    return %arg0, %c0_i32 : i32, i32
  }
}

</mosaic_0001>

<bundles_post_ra>
// kernel: tpu_custom_call.1
= control target key start
LH: loop header
LB: loop body
LE: loop exit
PB: predicated region body
PF: predicated region fallthrough
CT: control target
= control target key end

     0   :  { %v298_v1 = vmov 0   ;;  %s351_s0 = inlined_call_operand.vmem [shape: f32[8,1], index: 0, kind: input, shape index: {}]   ;;  %s352_s1 = inlined_call_operand.vmem [shape: f32[1,128], index: 1, kind: input, shape index: {}]   ;;  %s353_s2 = inlined_call_operand.hbm [shape: f32[8,256], index: 2, kind: output, shape index: {}]  }
   0x1   :  { %v12_v0 = vld [vmem:[%s351_s0] sm:$0xff]  ;;  %271 = vset.pattern.permute.xlu0 %v298_v1 }
   0x2   :  { %16 = vperm.xlu0 %271, %v12_v0  }
   0x3   :  { %7 = vsyncpa [#allocation3], 0  ;;  %v250_v2 = vld [vmem:[%s352_s1] ss:$0 sm:$0xff]  ;;  %v299_v16 = vmov 683565275  }
   0x4   :  { %v300_v18 = vmov 2475754826   ;;  %v301_v21 = vmov 2131351028   ;;  %v302_v24 = vmov 2102212464  }
   0x5   :  { %v303_v27 = vmov 920167782   ;;  %v304_v30 = vmov 1326507024   ;;  %s305_s0 = smov [#allocation2]  }
   0x6   :  { %s242_s1 = sshll.u32 %s305_s0, 4  ;;  %s243_s1 = int_to_ptr.vmem [resolvable:$true] %s242_s1 }
   0x7   :  { %s276_s13 = scalar_lea.vmem %s243_s1, 256  ;;  %p281_p1 = scmp.lt.s32.totalorder %s243_s1, %s243_s1 }
   0x8   :  { %p277_p0 = scmp.ne.s32.totalorder %s243_s1, %s276_s13  ;;  %p282_p2 = scmp.lt.s32.totalorder %s276_s13, %s276_s13 }
   0xa   :  { %p283_p3 = por %p282_p2, %p281_p1 }
   0xc   :  { %p284_p4 = pnand %p283_p3, %p277_p0 }
  0x7d   :  { %v17_v3 = vpop.permute.xlu0 %16 }
  0x7e   :  { %v25_v4 = vmul.f32 %v250_v2, %v17_v3 }
  0x80   :  { %v327_v5 = vmul.f32 6.2831855, %v25_v4 }
  0x82   :  { %v30_v6 = vand.u32 2139095040, %v327_v5  ;;  %v27_v10 = vand.u32 2147483647, %v327_v5  ;;  %vm29_vm7 = vcmp.lt.s32.totalorder %v327_v5, 0  ;;  %vm119_vm15 = vweird.f32 %v327_v5 }
  0x84   :  { %v31_v7 = vshrl.u32 %v30_v6, 23  ;;  %v34_v13 = vand.u32 8388607, %v27_v10  ;;  %vm28_vm8 = vcmp.le.f32.partialorder %v27_v10, 0.7853982 }
  0x86   :  { %v251_v8 = vadd.s32 4294967169, %v31_v7  ;;  %v35_v32 = vor.u32 8388608, %v34_v13 }
  0x88   :  { %v37_v9 = vadd.s32 1, %v251_v8  ;;  %v75_v46 = vshll.u32 %v35_v32, 8 }
  0x8a   :  { %vm38_vm0 = vcmp.gt.s32.totalorder %v37_v9, 0 }
  0x8b   :  { %v39_v11 = vsel %vm38_vm0, %v37_v9, 0 }
  0x8c   :  { %v41_v12 = vand.u32 31, %v39_v11  ;;  %v40_v15 = vshrl.u32 %v39_v11, 5 }
  0x8e   :  { %v42_v14 = vsub.s32 32, %v41_v12  ;;  %v44_v17 = vshll.u32 %v299_v16, %v41_v12  ;;  %v47_v19 = vshll.u32 %v300_v18, %v41_v12  ;;  %v50_v23 = vshll.u32 %v301_v21, %v41_v12 }
  0x8f   :  { %v53_v26 = vshll.u32 %v302_v24, %v41_v12  ;;  %v56_v29 = vshll.u32 %v303_v27, %v41_v12  ;;  %vm59_vm1 = vcmp.lt.s32.totalorder %v40_v15, 1  ;;  %vm62_vm2 = vcmp.lt.s32.totalorder %v40_v15, 4 }
  0x90   :  { %v45_v20 = vshrl.u32 %v300_v18, %v42_v14  ;;  %v48_v22 = vshrl.u32 %v301_v21, %v42_v14  ;;  %v51_v25 = vshrl.u32 %v302_v24, %v42_v14  ;;  %v54_v28 = vshrl.u32 %v303_v27, %v42_v14 }
  0x91   :  { %v57_v31 = vshrl.u32 %v304_v30, %v42_v14  ;;  %v43_v41 = vshrl.u32 %v299_v16, %v42_v14  ;;  %vm61_vm3 = vcmp.lt.s32.totalorder %v40_v15, 3  ;;  %vm60_vm4 = vcmp.lt.s32.totalorder %v40_v15, 2 }
  0x92   :  { %v46_v33 = vor.u32 %v45_v20, %v44_v17  ;;  %v49_v34 = vor.u32 %v48_v22, %v47_v19  ;;  %v52_v35 = vor.u32 %v51_v25, %v50_v23  ;;  %v55_v36 = vor.u32 %v54_v28, %v53_v26 }
  0x93   :  { %v58_v37 = vor.u32 %v57_v31, %v56_v29 }
  0x94   :  { %v64_v38 = vsel %vm62_vm2, %v52_v35, 2102212464  ;;  %v67_v39 = vsel %vm59_vm1, %v46_v33, %v49_v34  ;;  %v71_v40 = vsel %vm59_vm1, %v49_v34, %v52_v35  ;;  %v68_v42 = vsel %vm62_vm2, %v55_v36, 920167782 }
  0x95   :  { %v72_v43 = vsel %vm62_vm2, %v58_v37, 1326507024  ;;  %v69_v44 = vsel %vm61_vm3, %v52_v35, %v68_v42  ;;  %v63_v47 = vsel %vm59_vm1, %v43_v41, %v46_v33  ;;  %v65_v48 = vsel %vm61_vm3, %v49_v34, %v64_v38 }
  0x96   :  { %v73_v45 = vsel %vm61_vm3, %v55_v36, %v72_v43  ;;  %v70_v49 = vsel %vm60_vm4, %v67_v39, %v69_v44  ;;  %v66_v55 = vsel %vm60_vm4, %v63_v47, %v65_v48 }
  0x97   :  { %v74_v50 = vsel %vm60_vm4, %v71_v40, %v73_v45  ;;  %v336_v53 = vmul.u32.u64.low %v75_v46, %v70_v49  ;;  %v337_v54 = vmul.u32.u64.high %v75_v46, %v70_v49, %v336_v53  ;;  %v82_v57 = vmul.u32 %v75_v46, %v66_v55 }
  0x98   :  { %v333_v51 = vmul.u32.u64.low %v75_v46, %v74_v50  ;;  %v334_v52 = vmul.u32.u64.high %v75_v46, %v74_v50, %v333_v51 }
  0x99   :  { %v85_v56 = vadd.s32 1, %v337_v54 }
  0x9a   :  { %vm84_vm5 = vc.u32 %v334_v52, %v336_v53  ;;  %v83_v6 = vadd.s32 %v336_v53, %v334_v52 }
  0x9b   :  { %v86_v58 = vsel %vm84_vm5, %v85_v56, %v337_v54 }
  0x9c   :  { %v87_v59 = vadd.s32 %v86_v58, %v82_v57 }
  0x9e   :  { %v88_v60 = vadd.s32 536870912, %v87_v59 }
  0xa0   :  { %v89_v61 = vshrl.u32 %v88_v60, 30 }
  0xa2   :  { %v90_v62 = vshll.u32 %v89_v61, 30  ;;  %v113_v20 = vsub.s32 4, %v89_v61 }
  0xa4   :  { %v91_v63 = vsub.s32 %v87_v59, %v90_v62  ;;  %v114_v23 = vsel %vm29_vm7, %v113_v20, %v89_v61 }
  0xa5   :  { %v116_v24 = vsel %vm28_vm8, 0, %v114_v23 }
  0xa6   :  { %v93_v0 = vsub.s32 0, %v91_v63  ;;  %v120_v25 = vadd.s32 3, %v116_v24  ;;  %v225_v27 = vand.u32 3, %v116_v24 }
  0xa8   :  { %v252_v1 = vmin.u32 %v93_v0, %v91_v63  ;;  %v121_v26 = vand.u32 3, %v120_v25  ;;  %vm230_vm10 = vcmp.eq.s32.totalorder %v225_v27, 2  ;;  %vm227_vm12 = vcmp.eq.s32.totalorder %v225_v27, 0 }
  0xa9   :  { %vm226_vm14 = vcmp.lt.s32.totalorder %v225_v27, 2 }
  0xaa   :  { %v95_v2 = vclz %v252_v1  ;;  %vm126_vm9 = vcmp.eq.s32.totalorder %v121_v26, 2  ;;  %vm123_vm11 = vcmp.eq.s32.totalorder %v121_v26, 0  ;;  %vm122_vm13 = vcmp.lt.s32.totalorder %v121_v26, 2 }
  0xac   :  { %v253_v3 = vadd.s32 4294967294, %v95_v2 }
  0xae   :  { %vm254_vm6 = vcmp.lt.s32.totalorder %v253_v3, 0 }
  0xaf   :  { %v98_v4 = vsel %vm254_vm6, 0, %v253_v3 }
  0xb0   :  { %v99_v7 = vsub.s32 32, %v98_v4  ;;  %v103_v8 = vsub.s32 4294967266, %v98_v4  ;;  %v100_v9 = vshll.u32 %v91_v63, %v98_v4 }
  0xb2   :  { %v101_v11 = vshrl.u32 %v83_v6, %v99_v7  ;;  %v104_v12 = vadd.s32 127, %v103_v8 }
  0xb4   :  { %v102_v13 = vor.u32 %v101_v11, %v100_v9  ;;  %v105_v14 = vshll.u32 %v104_v12, 23 }
  0xb6   :  { %v106_v15 = vor.u32 4788187, %v105_v14  ;;  %v109_v17 = vcvt.s32.f32 %v102_v13 }
  0xb8   :  { %v107_v16 = vand.u32 2147483647, %v106_v15 }
  0xba   :  { %v110_v18 = vmul.f32 %v109_v17, %v107_v16 }
  0xbc   :  { %v111_v19 = vxor.u32 2147483648, %v110_v18 }
  0xbe   :  { %v112_v21 = vsel %vm29_vm7, %v111_v19, %v110_v18 }
  0xbf   :  { %v115_v22 = vsel %vm28_vm8, %v327_v5, %v112_v21 }
  0xc0   :  { %272 = vcosq.f32 %v115_v22 }
  0xc1   :  { %274 = vsinq.f32 %v115_v22 }
  0xcd   :  { %v273_v28 = vpop.eup %272 }
  0xce   :  { %v275_v29 = vpop.eup %274  ;;  %v127_v30 = vxor.u32 2147483648, %v273_v28 }
  0xcf   :  { %v124_v31 = vxor.u32 2147483648, %v275_v29 }
  0xd0   :  { %v128_v10 = vsel %vm126_vm9, %v127_v30, %v275_v29  ;;  %v232_v32 = vsel %vm230_vm10, %v127_v30, %v275_v29 }
  0xd1   :  { %v125_v33 = vsel %vm123_vm11, %v273_v28, %v124_v31  ;;  %v229_v34 = vsel %vm227_vm12, %v273_v28, %v124_v31 }
  0xd2   :  { %v129_v35 = vsel %vm122_vm13, %v125_v33, %v128_v10  ;;  %v233_v36 = vsel %vm226_vm14, %v229_v34, %v232_v32 }
  0xd3   :  { %v130_v37 = vsel %vm119_vm15, nan, %v129_v35  ;;  %v234_v38 = vsel %vm119_vm15, nan, %v233_v36 }
  0xd4   :  { %131 = vst [vmem:[#allocation2] sm:$0xff] %v130_v37  ;;  %235 = vst [vmem:[#allocation2 + $0x8] sm:$0xff] %v234_v38 }
  0xd5   :  { %287 = shalt.err (!%p284_p4)
}
  0xd6   :  { %245 = dma.vmem_to_hbm [thread:$0]  %s243_s1, 256, %s353_s2, [#allocation3]  }
  0xd7   :  { %296 = dma.done.wait [#allocation3], 256  }
  0xd8   :  { %297 = vsyncadd [#allocation3], 4294967040 }
  0xd9   :  { %249 = vsyncpa [#allocation3], 1 }

</bundles_post_ra>
